<compile_context>
chip_gen: v6e
topology: v6e:2x2x1
jax: 0.10.0
libtpu: 0.0.40
codegen_flags: <defaults>
</compile_context>

<pallas_src>
import functools

import jax
import jax.numpy as jnp
from jax.experimental import pallas as pl
from jax.experimental.pallas import tpu as pltpu

MAX_TILE_B = 2048  # ~85% of HBM roofline, safe inside v5e's scoped-VMEM default.


def _round_up(n, m):
    return ((n + m - 1) // m) * m


def _tiling(batch, max_tile_b=MAX_TILE_B):
    """Balanced batch tiling: tile_b multiple of 16, >=2 grid steps when the
    batch allows (v7x megacore), last tile balanced instead of cap-padded."""
    b16 = _round_up(batch, 16)
    n_tiles = max(pl.cdiv(b16, max_tile_b),        # respect the per-tile cap
                  min(2, b16 // 16))               # >=2 steps if batch allows
    tile_b = _round_up(pl.cdiv(batch, n_tiles), 16)
    n_tiles = pl.cdiv(batch, tile_b)
    b_pad = n_tiles * tile_b
    return tile_b, b_pad, n_tiles


def sequential_mlp_kernel(x_ref, w1_ref, b1_ref, w2_ref, b2_ref, w3_ref, b3_ref,
                          o_ref):
    """Fused forward of the sequential stack: (Linear+ReLU) x2 -> Linear.

    Activations are cast to bf16 for the MXU; accumulation, bias adds and the
    ReLU run in f32.  All operands are at their true feature widths.
    """
    x = x_ref[...].astype(jnp.bfloat16)                       # (TB, in_dim)

    # Layer 1: Linear + ReLU
    h1 = jnp.dot(x, w1_ref[...], preferred_element_type=jnp.float32)
    h1 = jnp.maximum(h1 + b1_ref[...], 0.0).astype(jnp.bfloat16)

    # Layer 2: Linear + ReLU
    h2 = jnp.dot(h1, w2_ref[...], preferred_element_type=jnp.float32)
    h2 = jnp.maximum(h2 + b2_ref[...], 0.0).astype(jnp.bfloat16)

    # Layer 3 (output module): Linear, no activation
    out = jnp.dot(h2, w3_ref[...], preferred_element_type=jnp.float32)
    o_ref[...] = (out + b3_ref[...]).astype(o_ref.dtype)


def prepare_params(params):
    """One-time parameter prep (hoisted out of the per-call path): weights in
    bf16 (native MXU dtype), biases kept f32 as (1, out) rows."""
    prepared = []
    for w, b in params:
        prepared.append((jnp.asarray(w, jnp.bfloat16),
                         jnp.asarray(b, jnp.float32).reshape(1, -1)))
    return tuple(prepared)


@functools.partial(jax.jit, static_argnames=("max_tile_b",))
def sequential_forward(x, prepared_params, max_tile_b=MAX_TILE_B):
    """Flattens trailing dims (like librl modules do) and runs the fused
    Pallas kernel over a 1-D batch grid.  Weights/biases use constant
    index_maps so they stay VMEM-resident across grid steps."""
    (w1, b1), (w2, b2), (w3, b3) = prepared_params

    batch = x.shape[0]
    x2d = x.reshape(batch, -1).astype(jnp.float32)
    in_dim = x2d.shape[1]
    out_dim = w3.shape[1]

    tile_b, b_pad, n_tiles = _tiling(batch, max_tile_b)
    if b_pad != batch:
        x2d = jnp.pad(x2d, ((0, b_pad - batch), (0, 0)))

    resident = lambda shape: pl.BlockSpec(shape, lambda i: (0, 0))

    out_padded = pl.pallas_call(
        sequential_mlp_kernel,
        out_shape=jax.ShapeDtypeStruct((b_pad, out_dim), jnp.float32),
        grid=(n_tiles,),
        in_specs=[
            # x: tiled over batch, true feature width (block last dim == full dim)
            pl.BlockSpec((tile_b, in_dim), lambda i: (i, 0)),
            resident(w1.shape), resident(b1.shape),   # w1, b1: VMEM-resident
            resident(w2.shape), resident(b2.shape),   # w2, b2
            resident(w3.shape), resident(b3.shape),   # w3, b3
        ],
        out_specs=pl.BlockSpec((tile_b, out_dim), lambda i: (i, 0)),
        compiler_params=pltpu.CompilerParams(
            dimension_semantics=("parallel",),  # v7x: shard batch tiles over 2 TCs
        ),
    )(x2d, w1, b1, w2, b2, w3, b3)

    return out_padded[:batch] if b_pad != batch else out_padded


def init_params(key, dims):
    """Deterministic Kaiming-ish init for each Linear in the sequential stack."""
    params = []
    for d_in, d_out in zip(dims[:-1], dims[1:]):
        key, kw, kb = jax.random.split(key, 3)
        scale = 1.0 / jnp.sqrt(jnp.float32(d_in))
        w = jax.random.uniform(kw, (d_in, d_out), jnp.float32, -scale, scale)
        b = jax.random.uniform(kb, (1, d_out), jnp.float32, -scale, scale)
        params.append((w, b))
    return params


def reference_forward_bf16(x, params):
    """Pure-JAX reference matching the kernel's numerics (bf16 MXU inputs,
    f32 accumulation / bias / ReLU)."""
    h = x.reshape(x.shape[0], -1).astype(jnp.float32)
    (w1, b1), (w2, b2), (w3, b3) = params
    d = lambda a, w: jnp.dot(a.astype(jnp.bfloat16), w.astype(jnp.bfloat16),
                             preferred_element_type=jnp.float32)
    h = jnp.maximum(d(h, w1) + b1, 0.0)
    h = jnp.maximum(d(h, w2) + b2, 0.0)
    return d(h, w3) + b3


def reference_forward_f32(x, params):
    """Full-precision reference of the same sequential stack."""
    h = x.reshape(x.shape[0], -1).astype(jnp.float32)
    (w1, b1), (w2, b2), (w3, b3) = params
    h = jnp.maximum(h @ w1 + b1, 0.0)
    h = jnp.maximum(h @ w2 + b2, 0.0)
    return h @ w3 + b3


if __name__ == "__main__":
    key = jax.random.PRNGKey(0)
    k_x, k_p = jax.random.split(key)

    batch, in_dim, hidden, out_dim = 8, 32, 64, 16
    x = jax.random.normal(k_x, (batch, in_dim), dtype=jnp.float32)
    params = init_params(k_p, (in_dim, hidden, hidden, out_dim))
    prepared = prepare_params(params)   # hoisted: bf16 cast / bias reshape once

    out = sequential_forward(x, prepared)
    out = jax.block_until_ready(out)

    assert out.shape == (batch, out_dim), out.shape

    ref_bf16 = reference_forward_bf16(x, params)
    assert jnp.allclose(out, ref_bf16, atol=1e-2, rtol=1e-2), \
        "mismatch vs bf16-matched reference"

    ref_f32 = reference_forward_f32(x, params)
    assert jnp.allclose(out, ref_f32, atol=5e-2, rtol=5e-2), \
        "mismatch vs f32 reference (beyond bf16 tolerance)"

    # Also exercise a batch that forces multiple grid steps + a padded tail.
    k_x2, _ = jax.random.split(k_x)
    x_big = jax.random.normal(k_x2, (40, in_dim), dtype=jnp.float32)
    out_big = jax.block_until_ready(sequential_forward(x_big, prepared))
    assert out_big.shape == (40, out_dim), out_big.shape
    assert jnp.allclose(out_big, reference_forward_bf16(x_big, params),
                        atol=1e-2, rtol=1e-2), "mismatch on multi-tile batch"

    # TODO(synk): recurrent()/save_hidden()/restore_hidden() are stateful RNN
    # bookkeeping with no kernel-side equivalent; only forward() is implemented.
    print("KERNEL_OK")
</pallas_src>

<mosaic_0001>
module attributes {stable_mosaic.version = 11 : i64} {
  func.func @sequential_mlp_kernel(%arg0: i32, %arg1: memref<16x32xf32, #tpu.memory_space<vmem>>, %arg2: memref<32x64xbf16, #tpu.memory_space<vmem>>, %arg3: memref<1x64xf32, #tpu.memory_space<vmem>>, %arg4: memref<64x64xbf16, #tpu.memory_space<vmem>>, %arg5: memref<1x64xf32, #tpu.memory_space<vmem>>, %arg6: memref<64x16xbf16, #tpu.memory_space<vmem>>, %arg7: memref<1x16xf32, #tpu.memory_space<vmem>>, %arg8: memref<16x16xf32, #tpu.memory_space<vmem>>) attributes {dimension_semantics = [#tpu.dimension_semantics<parallel>], iteration_bounds = array<i64: 1>, scalar_prefetch = 0 : i64, scratch_operands = 0 : i64, tpu.core_type = #tpu.core_type<tc>, window_params = [{transform_indices = @transform_0, window_bounds = array<i64: 16, 32>}, {pipeline_mode = #tpu.pipeline_mode<synchronous>, transform_indices = @transform_1, window_bounds = array<i64: 32, 64>}, {pipeline_mode = #tpu.pipeline_mode<synchronous>, transform_indices = @transform_2, window_bounds = array<i64: 1, 64>}, {pipeline_mode = #tpu.pipeline_mode<synchronous>, transform_indices = @transform_3, window_bounds = array<i64: 64, 64>}, {pipeline_mode = #tpu.pipeline_mode<synchronous>, transform_indices = @transform_4, window_bounds = array<i64: 1, 64>}, {pipeline_mode = #tpu.pipeline_mode<synchronous>, transform_indices = @transform_5, window_bounds = array<i64: 64, 16>}, {pipeline_mode = #tpu.pipeline_mode<synchronous>, transform_indices = @transform_6, window_bounds = array<i64: 1, 16>}, {transform_indices = @transform_7, window_bounds = array<i64: 16, 16>}]} {
    %c0 = arith.constant 0 : index
    %c0_0 = arith.constant 0 : index
    %0 = vector.load %arg1[%c0, %c0_0] : memref<16x32xf32, #tpu.memory_space<vmem>>, vector<16x32xf32>
    %1 = arith.truncf %0 : vector<16x32xf32> to vector<16x32xbf16>
    %c0_1 = arith.constant 0 : index
    %c0_2 = arith.constant 0 : index
    %2 = vector.load %arg2[%c0_1, %c0_2] : memref<32x64xbf16, #tpu.memory_space<vmem>>, vector<32x64xbf16>
    %cst = arith.constant dense<0.000000e+00> : vector<16x64xf32>
    %3 = tpu.matmul %1, %2, %cst {dimension_numbers = #tpu.dot_dimension_numbers<[1], [0], [0], [1], [0, 0, 1, 1], [], []>} : vector<16x32xbf16>, vector<32x64xbf16>, vector<16x64xf32> -> vector<16x64xf32>
    %c0_3 = arith.constant 0 : index
    %c0_4 = arith.constant 0 : index
    %4 = vector.load %arg3[%c0_3, %c0_4] : memref<1x64xf32, #tpu.memory_space<vmem>>, vector<1x64xf32>
    %5 = vector.broadcast %4 : vector<1x64xf32> to vector<16x64xf32>
    %6 = arith.addf %3, %5 : vector<16x64xf32>
    %cst_5 = arith.constant 0.000000e+00 : f32
    %7 = vector.broadcast %cst_5 : f32 to vector<16x64xf32>
    %8 = arith.maximumf %6, %7 : vector<16x64xf32>
    %9 = arith.truncf %8 : vector<16x64xf32> to vector<16x64xbf16>
    %c0_6 = arith.constant 0 : index
    %c0_7 = arith.constant 0 : index
    %10 = vector.load %arg4[%c0_6, %c0_7] : memref<64x64xbf16, #tpu.memory_space<vmem>>, vector<64x64xbf16>
    %cst_8 = arith.constant dense<0.000000e+00> : vector<16x64xf32>
    %11 = tpu.matmul %9, %10, %cst_8 {dimension_numbers = #tpu.dot_dimension_numbers<[1], [0], [0], [1], [0, 0, 1, 1], [], []>} : vector<16x64xbf16>, vector<64x64xbf16>, vector<16x64xf32> -> vector<16x64xf32>
    %c0_9 = arith.constant 0 : index
    %c0_10 = arith.constant 0 : index
    %12 = vector.load %arg5[%c0_9, %c0_10] : memref<1x64xf32, #tpu.memory_space<vmem>>, vector<1x64xf32>
    %13 = vector.broadcast %12 : vector<1x64xf32> to vector<16x64xf32>
    %14 = arith.addf %11, %13 : vector<16x64xf32>
    %cst_11 = arith.constant 0.000000e+00 : f32
    %15 = vector.broadcast %cst_11 : f32 to vector<16x64xf32>
    %16 = arith.maximumf %14, %15 : vector<16x64xf32>
    %17 = arith.truncf %16 : vector<16x64xf32> to vector<16x64xbf16>
    %c0_12 = arith.constant 0 : index
    %c0_13 = arith.constant 0 : index
    %18 = vector.load %arg6[%c0_12, %c0_13] : memref<64x16xbf16, #tpu.memory_space<vmem>>, vector<64x16xbf16>
    %cst_14 = arith.constant dense<0.000000e+00> : vector<16x16xf32>
    %19 = tpu.matmul %17, %18, %cst_14 {dimension_numbers = #tpu.dot_dimension_numbers<[1], [0], [0], [1], [0, 0, 1, 1], [], []>} : vector<16x64xbf16>, vector<64x16xbf16>, vector<16x16xf32> -> vector<16x16xf32>
    %c0_15 = arith.constant 0 : index
    %c0_16 = arith.constant 0 : index
    %20 = vector.load %arg7[%c0_15, %c0_16] : memref<1x16xf32, #tpu.memory_space<vmem>>, vector<1x16xf32>
    %21 = vector.broadcast %20 : vector<1x16xf32> to vector<16x16xf32>
    %22 = arith.addf %19, %21 : vector<16x16xf32>
    %c0_17 = arith.constant 0 : index
    %c0_18 = arith.constant 0 : index
    %23 = vector.load %arg8[%c0_17, %c0_18] : memref<16x16xf32, #tpu.memory_space<vmem>>, vector<16x16xf32>
    tpu.vector_store %arg8[%c0_17, %c0_18], %22 {strides = array<i32>} : memref<16x16xf32, #tpu.memory_space<vmem>>, vector<16x16xf32>,
    return
  }
  func.func @transform_0(%arg0: i32) -> (i32, i32) {
    %c0_i32 = arith.constant 0 : i32
    %c0_i32_0 = arith.constant 0 : i32
    return %arg0, %c0_i32 : i32, i32
  }
  func.func @transform_1(%arg0: i32) -> (i32, i32) {
    %c0_i32 = arith.constant 0 : i32
    %c0_i32_0 = arith.constant 0 : i32
    %c0_i32_1 = arith.constant 0 : i32
    return %c0_i32, %c0_i32_0 : i32, i32
  }
  func.func @transform_2(%arg0: i32) -> (i32, i32) {
    %c0_i32 = arith.constant 0 : i32
    %c0_i32_0 = arith.constant 0 : i32
    %c0_i32_1 = arith.constant 0 : i32
    return %c0_i32, %c0_i32_0 : i32, i32
  }
  func.func @transform_3(%arg0: i32) -> (i32, i32) {
    %c0_i32 = arith.constant 0 : i32
    %c0_i32_0 = arith.constant 0 : i32
    %c0_i32_1 = arith.constant 0 : i32
    return %c0_i32, %c0_i32_0 : i32, i32
  }
  func.func @transform_4(%arg0: i32) -> (i32, i32) {
    %c0_i32 = arith.constant 0 : i32
    %c0_i32_0 = arith.constant 0 : i32
    %c0_i32_1 = arith.constant 0 : i32
    return %c0_i32, %c0_i32_0 : i32, i32
  }
  func.func @transform_5(%arg0: i32) -> (i32, i32) {
    %c0_i32 = arith.constant 0 : i32
    %c0_i32_0 = arith.constant 0 : i32
    %c0_i32_1 = arith.constant 0 : i32
    return %c0_i32, %c0_i32_0 : i32, i32
  }
  func.func @transform_6(%arg0: i32) -> (i32, i32) {
    %c0_i32 = arith.constant 0 : i32
    %c0_i32_0 = arith.constant 0 : i32
    %c0_i32_1 = arith.constant 0 : i32
    return %c0_i32, %c0_i32_0 : i32, i32
  }
  func.func @transform_7(%arg0: i32) -> (i32, i32) {
    %c0_i32 = arith.constant 0 : i32
    %c0_i32_0 = arith.constant 0 : i32
    return %arg0, %c0_i32 : i32, i32
  }
}

</mosaic_0001>

<bundles_post_ra>
// kernel: sequential_forward.1
= control target key start
LH: loop header
LB: loop body
LE: loop exit
PB: predicated region body
PF: predicated region fallthrough
CT: control target
= control target key end

     0   :  { %v351_v0 = vmov 0.0   ;;  %vm352_vm0 = vmmov 0   ;;  %vm53_vm1 = vcmask 261120   ;;  %vm140_vm2 = vcmask 523264   ;;  %s449_s1 = inlined_call_operand.vmem [shape: bf16[32,64], index: 1, kind: input, shape index: {}]   ;;  %s450_s0 = inlined_call_operand.vmem [shape: f32[16,32], index: 0, kind: input, shape index: {}]   ;;  %s451_s3 = inlined_call_operand.vmem [shape: bf16[64,64], index: 3, kind: input, shape index: {}]   ;;  %s452_s5 = inlined_call_operand.vmem [shape: bf16[64,16], index: 5, kind: input, shape index: {}]   ;;  %s453_s2 = inlined_call_operand.vmem [shape: f32[1,64], index: 2, kind: input, shape index: {}]   ;;  %s454_s4 = inlined_call_operand.vmem [shape: f32[1,64], index: 4, kind: input, shape index: {}]   ;;  %s455_s6 = inlined_call_operand.vmem [shape: f32[1,16], index: 6, kind: input, shape index: {}]   ;;  %s456_s7 = inlined_call_operand.vmem [shape: f32[16,16], index: 7, kind: output, shape index: {}]  }
   0x1   :  { %307 = vmatprep.subr.bf16.mxu0 %v351_v0  ;;  %v341_v1 = vld [vmem:[%s449_s1 + $0x8] sm:$0xff]   ;;  %311 = vmatprep.mubr.msk.bf16.mxu0 %vm352_vm0, %v351_v0  ;;  %v342_v2 = vld [vmem:[%s449_s1] sm:$0xff]   ;;  %v343_v5 = vld [vmem:[%s451_s3 + $0x18] sm:$0xff]   ;;  %vm271_vm3 = vcmask 130048  }
   0x2   :  { %315 = vmatprep.subr.bf16.mxu1 %v351_v0  ;;  %323 = vmatprep.mubr.msk.bf16.mxu1 %vm352_vm0, %v351_v0  ;;  %v27_v3 = vld [vmem:[%s450_s0] sm:$0xff]  ;;  %v28_v4 = vld [vmem:[%s450_s0 + $0x8] sm:$0xff]  ;;  %v344_v7 = vld [vmem:[%s451_s3 + $0x10] sm:$0xff]  }
   0x3   :  { %308 = vmatpush3.bf16.msra.mxu0 %v341_v1  ;;  %v29_v6 = vpack.c.bf16 %v28_v4, %v27_v3  ;;  %316 = vmatpush3.bf16.msra.mxu1 %v343_v5  ;;  %v345_v8 = vld [vmem:[%s451_s3 + $0x8] sm:$0xff]   ;;  %v346_v9 = vld [vmem:[%s451_s3] sm:$0xff]   ;;  %v347_v10 = vld [vmem:[%s452_s5 + $0x18] sm:$0xff]  }
   0x4   :  { %309 = vmatprep.subr.bf16.mxu0 %v351_v0  ;;  %317 = vmatprep.subr.bf16.mxu1 %v351_v0  ;;  %v278_v11 = vld [vmem:[%s453_s2] ss:$0 sm:$0xff]  ;;  %v348_v21 = vld [vmem:[%s452_s5 + $0x10] sm:$0xff]   ;;  %v349_v22 = vld [vmem:[%s452_s5 + $0x8] sm:$0xff]  }
   0x5   :  { %v350_v23 = vld [vmem:[%s452_s5] sm:$0xff]  }
   0x6   :  { %v282_v24 = vld [vmem:[%s454_s4] ss:$0 sm:$0xff] }
   0x7   :  { %310 = vmatpush3.bf16.msra.mxu0 %v342_v2  ;;  %318 = vmatpush3.bf16.msra.mxu1 %v344_v7  ;;  %v288_v34 = vld [vmem:[%s455_s6] ss:$0 sm:$0xff] }
   0x8   :  { %327 = vmatprep.subr.bf16.mxu0 %v351_v0  ;;  %319 = vmatprep.subr.bf16.mxu1 %v351_v0 }
   0xa   :  { %312 = vmatmul.mubr.msk.bf16.vlgmr.msra.gmra.mxu0 %vm53_vm1, %v29_v6 }
   0xb   :  { %335 = vmatprep.mubr.msk.bf16.mxu0 %vm352_vm0, %v351_v0  ;;  %320 = vmatpush3.bf16.msra.mxu1 %v345_v8 }
   0xc   :  { %321 = vmatprep.subr.bf16.mxu1 %v351_v0  ;;  %328 = vmatpush3.bf16.msra.mxu0 %v347_v10 }
   0xd   :  { %329 = vmatprep.subr.bf16.mxu0 %v351_v0 }
   0xf   :  { %322 = vmatpush3.bf16.msra.mxu1 %v346_v9 }
  0x10   :  { %330 = vmatpush3.bf16.msra.mxu0 %v348_v21 }
  0x11   :  { %331 = vmatprep.subr.bf16.mxu0 %v351_v0 }
  0x14   :  { %332 = vmatpush3.bf16.msra.mxu0 %v349_v22 }
  0x15   :  { %333 = vmatprep.subr.bf16.mxu0 %v351_v0 }
  0x18   :  { %334 = vmatpush3.bf16.msra.mxu0 %v350_v23 }
  0xca   :  { %v91_v12 = vpop.f32.mrf.mxu0 }
  0xcb   :  { %v92_v14 = vadd.f32 %v278_v11, %v91_v12 }
  0xcc   :  { %v313_v13 = vpop.f32.mrf.mxu0 }
  0xcd   :  { %v98_v18 = vmax.f32 %v92_v14, 0.0 }
  0xce   :  { %v94_v15 = vpop.f32.mrf.mxu0 }
  0xcf   :  { %v95_v16 = vadd.f32 %v278_v11, %v94_v15 }
  0xd0   :  { %v314_v17 = vpop.f32.mrf.mxu0 }
  0xd1   :  { %v99_v19 = vmax.f32 %v95_v16, 0.0 }
  0xd3   :  { %v100_v20 = vpack.c.bf16 %v99_v19, %v98_v18 }
  0xd5   :  { %324 = vmatmul.mubr.msk.bf16.vlgmr.msra.gmra.mxu1 %vm140_vm2, %v100_v20 }
 0x195   :  { %v178_v25 = vpop.f32.mrf.mxu1 }
 0x196   :  { %v179_v27 = vadd.f32 %v282_v24, %v178_v25 }
 0x197   :  { %v325_v26 = vpop.f32.mrf.mxu1 }
 0x198   :  { %v185_v31 = vmax.f32 %v179_v27, 0.0 }
 0x199   :  { %v181_v28 = vpop.f32.mrf.mxu1 }
 0x19a   :  { %v182_v29 = vadd.f32 %v282_v24, %v181_v28 }
 0x19b   :  { %v326_v30 = vpop.f32.mrf.mxu1 }
 0x19c   :  { %v186_v32 = vmax.f32 %v182_v29, 0.0 }
 0x19e   :  { %v187_v33 = vpack.c.bf16 %v186_v32, %v185_v31 }
 0x1a0   :  { %336 = vmatmul.mubr.msk.bf16.vlgmr.msra.gmra.mxu0 %vm140_vm2, %v187_v33 }
 0x260   :  { %v264_v35 = vpop.f32.mrf.mxu0 }
 0x261   :  { %v265_v36 = vadd.f32 %v288_v34, %v264_v35 }
 0x262   :  { %v337_v37 = vpop.f32.mrf.mxu0 }
 0x263   :  { %272 = vst.msk [vmem:[%s456_s7] sm:$0xff] %vm271_vm3, %v265_v36 }
 0x264   :  { %v267_v38 = vpop.f32.mrf.mxu0 }
 0x265   :  { %v268_v39 = vadd.f32 %v288_v34, %v267_v38 }
 0x266   :  { %v338_v40 = vpop.f32.mrf.mxu0 }
 0x267   :  { %273 = vst.msk [vmem:[%s456_s7 + $0x8] sm:$0xff] %vm271_vm3, %v268_v39 }

</bundles_post_ra>
